<compile_context>
chip_gen: v7x
topology: tpu7x:2x2x1
jax: 0.10.0
libtpu: 0.0.40
codegen_flags: <defaults>
</compile_context>

<pallas_src>
import jax
import jax.numpy as jnp
from jax.experimental import pallas as pl
from jax.experimental.pallas import tpu as pltpu

NN_FORMAT = [152, 8, 6]


def dynamic_nn_kernel(x_ref, w_ref, b_ref, o_ref):
    # x: [TB, 152] f32, w: [152, 6] f32, b: [1, 6] f32  ->  o: [TB, 6] i8
    logits = jnp.dot(x_ref[...], w_ref[...],
                     preferred_element_type=jnp.float32) + b_ref[...]
    # sigmoid(z) > 0.5  <=>  z > 0
    o_ref[...] = (logits > 0.0).astype(jnp.int8)


def _round_up(n, m):
    return ((n + m - 1) // m) * m


def dynamic_nn_forward(x, params, tile_b=8192, as_bool=True):
    """x: [B, 152] float32 (or bfloat16) -> bool [B, 6] (int8 if as_bool=False)."""
    w01, b01, w02, b02, w12, b12 = params
    f_in, f_out = NN_FORMAT[0], NN_FORMAT[-1]
    B = x.shape[0]

    # Fold the whole network into one [152, 6] GEMM (trace-time math, f32).
    w_eff = (w02 + w01 @ w12).astype(x.dtype)     # [152, 6]
    b_eff = (b02 + b01 @ w12 + b12)               # [1, 6] f32 (accumulator dtype)

    # --- Batch tile selection -------------------------------------------------
    # Multiple of 32 (int8 output sublane packing) and >= 2 grid steps for
    # moderate batches so v7x's two TensorCores both get work.
    tile_b = max(32, (int(tile_b) // 32) * 32)
    TB = min(tile_b, _round_up(pl.cdiv(B, 2), 256))
    if B <= TB:
        # Single full block equal to the array extent (no partial-block path,
        # second-to-last block dim == full array dim is always legal).
        TB = B
    num_tiles = pl.cdiv(B, TB)

    # --- VMEM budget ----------------------------------------------------------
    # x rows occupy 256 lanes in VMEM (152 pads up to 2x128); out rows 128 lanes
    # of int8; weights/bias are tiny residents. 2x for double buffering.
    x_bytes = 2 * TB * 256 * x.dtype.itemsize
    o_bytes = 2 * TB * 128 * 1
    w_bytes = 2 * (_round_up(f_in, 8) * 128 * 4 + 8 * 128 * 4)
    vmem_limit = x_bytes + o_bytes + w_bytes + (4 << 20)      # + compiler headroom
    vmem_limit = min(max(vmem_limit, 16 << 20), 40 << 20)     # safe on v5e/v6e/v7x

    out_i8 = pl.pallas_call(
        dynamic_nn_kernel,
        out_shape=jax.ShapeDtypeStruct((B, f_out), jnp.int8),
        grid=(num_tiles,),
        in_specs=[
            pl.BlockSpec((TB, f_in), lambda i: (i, 0)),      # x tile (pipelined)
            pl.BlockSpec((f_in, f_out), lambda i: (0, 0)),   # W_eff (resident)
            pl.BlockSpec((1, f_out), lambda i: (0, 0)),      # b_eff (resident)
        ],
        out_specs=pl.BlockSpec((TB, f_out), lambda i: (i, 0)),
        compiler_params=pltpu.CompilerParams(
            dimension_semantics=("parallel",),
            vmem_limit_bytes=int(vmem_limit)),
    )(x, w_eff, b_eff)

    if as_bool:
        # Module semantics return bool; consumers that can take int8 should use
        # as_bool=False to skip this extra elementwise pass (~2% of HBM traffic).
        return out_i8.astype(jnp.bool_)
    return out_i8


def init_params(key):
    """Deterministic param init matching PyTorch nn.Linear shapes
    (uniform +/-1/sqrt(fan_in)); weights stored [in, out]."""
    f_in, f_hid, f_out = NN_FORMAT
    ks = jax.random.split(key, 6)

    def lin(kw, kb, fan_in, fan_out):
        bound = 1.0 / jnp.sqrt(jnp.float32(fan_in))
        w = jax.random.uniform(kw, (fan_in, fan_out), jnp.float32, -bound, bound)
        b = jax.random.uniform(kb, (1, fan_out), jnp.float32, -bound, bound)
        return w, b

    w01, b01 = lin(ks[0], ks[1], f_in, f_hid)   # Linear(152, 8)
    w02, b02 = lin(ks[2], ks[3], f_in, f_out)   # Linear(152, 6)
    w12, b12 = lin(ks[4], ks[5], f_hid, f_out)  # Linear(8, 6)
    return (w01, b01, w02, b02, w12, b12)


def reference_forward(x, params):
    """Pure-JAX reference of the (unfused) PyTorch forward; also returns logits."""
    w01, b01, w02, b02, w12, b12 = params
    h1 = x @ w01 + b01
    out = (x @ w02 + b02) + (h1 @ w12 + b12)
    return jax.nn.sigmoid(out) > 0.5, out


def _check(out, ref_bool, ref_logits, tol=1e-4):
    # The trace-time fold changes FP summation order vs the unfused reference,
    # so only allow disagreement where the reference logit is essentially zero.
    agree = (out == ref_bool) | (jnp.abs(ref_logits) < tol)
    return bool(jnp.all(agree))


if __name__ == "__main__":
    key = jax.random.PRNGKey(0)
    k_p, k_x, k_x2 = jax.random.split(key, 3)

    params = init_params(k_p)

    # Small spec-sized case (single block equal to the batch).
    batch = 2
    x = jax.random.normal(k_x, (batch, NN_FORMAT[0]), jnp.float32)
    out = jax.block_until_ready(dynamic_nn_forward(x, params))
    ref_bool, ref_logits = reference_forward(x, params)
    assert out.shape == (batch, NN_FORMAT[-1])
    assert out.dtype == jnp.bool_
    assert _check(out, ref_bool, ref_logits)

    # Multi-tile path with a ragged (masked partial) last block, no padding.
    batch2 = 390
    x2 = jax.random.normal(k_x2, (batch2, NN_FORMAT[0]), jnp.float32)
    out2 = jax.block_until_ready(dynamic_nn_forward(x2, params, tile_b=128))
    ref_bool2, ref_logits2 = reference_forward(x2, params)
    assert out2.shape == (batch2, NN_FORMAT[-1])
    assert _check(out2, ref_bool2, ref_logits2)

    # Raw int8 path (consumers that skip the bool cast entirely).
    out3 = jax.block_until_ready(dynamic_nn_forward(x2, params, tile_b=128,
                                                    as_bool=False))
    assert out3.dtype == jnp.int8
    assert _check(out3.astype(jnp.bool_), ref_bool2, ref_logits2)

    print("KERNEL_OK")
</pallas_src>

<mosaic_0001>
module attributes {stable_mosaic.version = 11 : i64} {
  func.func @dynamic_nn_kernel(%arg0: i32, %arg1: memref<2x152xf32, #tpu.memory_space<vmem>>, %arg2: memref<152x6xf32, #tpu.memory_space<vmem>>, %arg3: memref<1x6xf32, #tpu.memory_space<vmem>>, %arg4: memref<2x6xi8, #tpu.memory_space<vmem>>) attributes {dimension_semantics = [#tpu.dimension_semantics<parallel>], iteration_bounds = array<i64: 1>, scalar_prefetch = 0 : i64, scratch_operands = 0 : i64, tpu.core_type = #tpu.core_type<tc>, window_params = [{transform_indices = @transform_0, window_bounds = array<i64: 2, 152>}, {pipeline_mode = #tpu.pipeline_mode<synchronous>, transform_indices = @transform_1, window_bounds = array<i64: 152, 6>}, {pipeline_mode = #tpu.pipeline_mode<synchronous>, transform_indices = @transform_2, window_bounds = array<i64: 1, 6>}, {transform_indices = @transform_3, window_bounds = array<i64: 2, 6>}]} {
    %c0 = arith.constant 0 : index
    %c0_0 = arith.constant 0 : index
    %0 = vector.load %arg1[%c0, %c0_0] : memref<2x152xf32, #tpu.memory_space<vmem>>, vector<2x152xf32>
    %c0_1 = arith.constant 0 : index
    %c0_2 = arith.constant 0 : index
    %1 = vector.load %arg2[%c0_1, %c0_2] : memref<152x6xf32, #tpu.memory_space<vmem>>, vector<152x6xf32>
    %cst = arith.constant dense<0.000000e+00> : vector<2x6xf32>
    %2 = tpu.matmul %0, %1, %cst {dimension_numbers = #tpu.dot_dimension_numbers<[1], [0], [0], [1], [0, 0, 1, 1], [], []>} : vector<2x152xf32>, vector<152x6xf32>, vector<2x6xf32> -> vector<2x6xf32>
    %c0_3 = arith.constant 0 : index
    %c0_4 = arith.constant 0 : index
    %3 = vector.load %arg3[%c0_3, %c0_4] : memref<1x6xf32, #tpu.memory_space<vmem>>, vector<1x6xf32>
    %4 = vector.broadcast %3 : vector<1x6xf32> to vector<2x6xf32>
    %5 = arith.addf %2, %4 : vector<2x6xf32>
    %cst_5 = arith.constant 0.000000e+00 : f32
    %6 = vector.broadcast %cst_5 : f32 to vector<2x6xf32>
    %7 = arith.cmpf ogt, %5, %6 : vector<2x6xf32>
    %8 = arith.extui %7 : vector<2x6xi1> to vector<2x6xi8>
    %c0_6 = arith.constant 0 : index
    %c0_7 = arith.constant 0 : index
    %9 = vector.load %arg4[%c0_6, %c0_7] : memref<2x6xi8, #tpu.memory_space<vmem>>, vector<2x6xi8>
    tpu.vector_store %arg4[%c0_6, %c0_7], %8 {strides = array<i32>} : memref<2x6xi8, #tpu.memory_space<vmem>>, vector<2x6xi8>,
    return
  }
  func.func @transform_0(%arg0: i32) -> (i32, i32) {
    %c0_i32 = arith.constant 0 : i32
    %c0_i32_0 = arith.constant 0 : i32
    return %arg0, %c0_i32 : i32, i32
  }
  func.func @transform_1(%arg0: i32) -> (i32, i32) {
    %c0_i32 = arith.constant 0 : i32
    %c0_i32_0 = arith.constant 0 : i32
    %c0_i32_1 = arith.constant 0 : i32
    return %c0_i32, %c0_i32_0 : i32, i32
  }
  func.func @transform_2(%arg0: i32) -> (i32, i32) {
    %c0_i32 = arith.constant 0 : i32
    %c0_i32_0 = arith.constant 0 : i32
    %c0_i32_1 = arith.constant 0 : i32
    return %c0_i32, %c0_i32_0 : i32, i32
  }
  func.func @transform_3(%arg0: i32) -> (i32, i32) {
    %c0_i32 = arith.constant 0 : i32
    %c0_i32_0 = arith.constant 0 : i32
    return %arg0, %c0_i32 : i32, i32
  }
}

</mosaic_0001>

<bundles_post_ra>
// kernel: tpu_custom_call.1
= control target key start
LH: loop header
LB: loop body
LE: loop exit
PB: predicated region body
PF: predicated region fallthrough
CT: control target
= control target key end

     0   :  { %v209_v3 = vmov 0.0|0.0   ;;  %vm54_vm0 = vcmask 195584   ;;  %s308_s0 = inlined_call_operand.vmem [shape: f32[2,152], index: 0, kind: input, shape index: {}]   ;;  %s309_s1 = inlined_call_operand.vmem [shape: f32[152,6], index: 1, kind: input, shape index: {}]   ;;  %s310_s2 = inlined_call_operand.vmem [shape: f32[1,6], index: 2, kind: input, shape index: {}]   ;;  %s311_s3 = inlined_call_operand.hbm [shape: s8[2,6], index: 3, kind: output, shape index: {}]  }
   0x1   :  { %v18_v0 = vld [vmem:[%s309_s1] sm:$0xff]  ;;  %v19_v1 = vld [vmem:[%s309_s1 + $0x8] sm:$0xff]  ;;  %v20_v2 = vld [vmem:[%s309_s1 + $0x10] sm:$0xff]  ;;  %154 = vmatprep.subr.bf16.mxu0 %v209_v3 }
   0x2   :  { %v155_v4 = vpack.c.bf16 %v19_v1, %v18_v0  ;;  %v21_v5 = vld [vmem:[%s309_s1 + $0x18] sm:$0xff]  ;;  %v22_v7 = vld [vmem:[%s309_s1 + $0x20] sm:$0xff]  ;;  %v23_v8 = vld [vmem:[%s309_s1 + $0x28] sm:$0xff] }
   0x3   :  { %v158_v6 = vpack.c.bf16 %v21_v5, %v20_v2  ;;  %v152_v9 = vld.sshfl [vmem:[%s308_s0] sm:$0x33 pattern:$0x76325410]  ;;  %v161_v10 = vpack.c.bf16 %v23_v8, %v22_v7 }
   0x4   :  { %156 = vmatpush1.bf16.msra.mxu0 %v155_v4  ;;  %v52_v11 = vcombine.high %v152_v9, %v152_v9 }
   0x5   :  { %157 = vmatprep.subr.bf16.mxu0 %v209_v3 }
   0x8   :  { %159 = vmatpush1.bf16.msra.mxu0 %v158_v6 }
   0x9   :  { %8 = vsyncpa [#allocation3], 0  ;;  %160 = vmatprep.subr.bf16.mxu0 %v209_v3  ;;  %v24_v12 = vld [vmem:[%s309_s1 + $0x30] sm:$0xff]  ;;  %v25_v13 = vld [vmem:[%s309_s1 + $0x38] sm:$0xff]  ;;  %153 = vmatprep.mubr.msk.f32.mxu0 %vm54_vm0, %v52_v11  ;;  %v210_v30 = vmov 0.0   ;;  %vm131_vm1 = vcmask 40960  }
   0xa   :  { %v164_v14 = vpack.c.bf16 %v25_v13, %v24_v12  ;;  %v26_v15 = vld [vmem:[%s309_s1 + $0x40] sm:$0xff]  ;;  %v27_v16 = vld [vmem:[%s309_s1 + $0x48] sm:$0xff]  ;;  %v28_v18 = vld [vmem:[%s309_s1 + $0x50] sm:$0xff]  ;;  %vm132_vm2 = vsmask.f32 256  ;;  %s211_s26 = smov [#allocation2]  }
   0xb   :  { %v167_v17 = vpack.c.bf16 %v27_v16, %v26_v15  ;;  %v29_v19 = vld [vmem:[%s309_s1 + $0x58] sm:$0xff]  ;;  %v30_v21 = vld [vmem:[%s309_s1 + $0x60] sm:$0xff]  ;;  %v31_v22 = vld [vmem:[%s309_s1 + $0x68] sm:$0xff]  ;;  %s143_s27 = sshll.u32 %s211_s26, 4  ;;  %v212_v37 = vmov 0   ;;  %s144_s27 = int_to_ptr.vmem [resolvable:$true] %s143_s27 }
   0xc   :  { %162 = vmatpush1.bf16.msra.mxu0 %v161_v10  ;;  %v170_v20 = vpack.c.bf16 %v29_v19, %v28_v18  ;;  %v173_v23 = vpack.c.bf16 %v31_v22, %v30_v21  ;;  %v32_v24 = vld [vmem:[%s309_s1 + $0x70] sm:$0xff]  ;;  %v33_v25 = vld [vmem:[%s309_s1 + $0x78] sm:$0xff]  ;;  %v34_v27 = vld [vmem:[%s309_s1 + $0x80] sm:$0xff]  ;;  %p190_p1 = scmp.lt.s32.totalorder %s144_s27, %s144_s27 }
   0xd   :  { %163 = vmatprep.subr.bf16.mxu0 %v209_v3  ;;  %v176_v26 = vpack.c.bf16 %v33_v25, %v32_v24  ;;  %v35_v28 = vld [vmem:[%s309_s1 + $0x88] sm:$0xff]  ;;  %v36_v31 = vld [vmem:[%s309_s1 + $0x90] sm:$0xff]  ;;  %v151_v32 = vld [vmem:[%s310_s2] ss:$0 sm:$0xff]  ;;  %s185_s1 = scalar_lea.vmem %s144_s27, 16  ;;  %s189_s2 = scalar_lea.vmem %s144_s27, 32 }
   0xe   :  { %v179_v29 = vpack.c.bf16 %v35_v28, %v34_v27  ;;  %vm133_vm4 = vmand %vm131_vm1, %vm132_vm2  ;;  %v134_v36 = vld [vmem:[#allocation2] sm:$0x1]  ;;  %p186_p0 = scmp.ne.s32.totalorder %s144_s27, %s185_s1  ;;  %p191_p2 = scmp.lt.s32.totalorder %s189_s2, %s185_s1 }
  0x10   :  { %165 = vmatpush1.bf16.msra.mxu0 %v164_v14  ;;  %p192_p3 = por %p191_p2, %p190_p1 }
  0x11   :  { %166 = vmatprep.subr.bf16.mxu0 %v209_v3 }
  0x12   :  { %p193_p4 = pnand %p192_p3, %p186_p0 }
  0x14   :  { %168 = vmatpush1.bf16.msra.mxu0 %v167_v17 }
  0x15   :  { %169 = vmatprep.subr.bf16.mxu0 %v209_v3 }
  0x18   :  { %171 = vmatpush1.bf16.msra.mxu0 %v170_v20 }
  0x19   :  { %172 = vmatprep.subr.bf16.mxu0 %v209_v3 }
  0x1c   :  { %174 = vmatpush1.bf16.msra.mxu0 %v173_v23 }
  0x1d   :  { %175 = vmatprep.subr.bf16.mxu0 %v209_v3 }
  0x20   :  { %177 = vmatpush1.bf16.msra.mxu0 %v176_v26 }
  0x21   :  { %178 = vmatprep.subr.bf16.mxu0 %v209_v3 }
  0x24   :  { %180 = vmatpush1.bf16.msra.mxu0 %v179_v29 }
  0x25   :  { %93 = vmatprep.subr.mxu0 %v210_v30 }
  0x28   :  { %94 = vmatpush1.msra.mxu0 %v36_v31 }
  0x29   :  { %122 = vmatmul.mubr.f32.vlgmr.msra.gmra.mrb[0].mxu0 %v152_v9 }
  0xfc   :  { %v123_v33 = vpop.f32.mrb[0].mxu0 }
  0xfd   :  { %v124_v34 = vadd.f32 %v151_v32, %v123_v33  ;;  %v125_v35 = vpop.f32.mrb[1].mxu0 }
  0xff   :  { %vm127_vm3 = vcmp.gt.f32.partialorder %v124_v34, 0.0 }
 0x100   :  { %vm128_vm5 = vmpackc.low %vm127_vm3, %vm127_vm3 }
 0x101   :  { %vm129_vm6 = vmpackc.even %vm128_vm5, %vm128_vm5 }
 0x102   :  { %v130_v38 = vsel %vm129_vm6, 16843009, %v212_v37 }
 0x103   :  { %v135_v39 = vsel %vm133_vm4, %v130_v38, %v134_v36 }
 0x104   :  { %136 = vst [vmem:[#allocation2] sm:$0x1] %v135_v39 }
 0x105   :  { %196 = shalt.err (!%p193_p4)
}
 0x106   :  { %s197_s30 = scalar_lea.hbm %s311_s3, 16 }
 0x107   :  { %p198_p5 = scmp.ne.s32.totalorder %s311_s3, %s197_s30  ;;  %p201_p6 = scmp.lt.u32.totalorder %s197_s30, %s311_s3 }
 0x109   :  { %p203_p7 = pnand %p201_p6, %p198_p5 }
 0x10b   :  { %206 = shalt.err (!%p203_p7)
}
 0x10c   :  { %146 = dma.vmem_to_hbm [thread:$0]  %s144_s27, 16, %s311_s3, [#allocation3]  }
 0x10d   :  { %207 = dma.done.wait [#allocation3], 16  }
 0x10e   :  { %208 = vsyncadd [#allocation3], 4294967280 }
 0x10f   :  { %150 = vsyncpa [#allocation3], 1 }

</bundles_post_ra>
